<compile_context>
chip_gen: v6e
topology: v6e:2x2x1
jax: 0.10.0
libtpu: 0.0.40
codegen_flags: <defaults>
</compile_context>

<pallas_src>
import math

import jax
import jax.numpy as jnp
from jax.experimental import pallas as pl
from jax.experimental.pallas import tpu as pltpu


_PRECISION = jax.lax.Precision.HIGHEST
_KRON_BYTES_LIMIT = 2 * 1024 * 1024      # use fused single-matmul path below this
_VMEM_BUDGET = 32 * 1024 * 1024          # budget for blocks + temporaries
_VMEM_LIMIT = 64 * 1024 * 1024           # scoped VMEM limit passed to Mosaic


# ---------------------------------------------------------------------------
# Glue: separable bilinear interpolation weight matrices (plain JAX, tiny).
# ---------------------------------------------------------------------------
def _bilinear_weight_matrix(in_size: int, out_size: int) -> jnp.ndarray:
    """(out_size, in_size) bilinear matrix; PyTorch align_corners=False, antialias=False."""
    if in_size == out_size:
        return jnp.eye(out_size, dtype=jnp.float32)
    scale = in_size / out_size
    dst = jnp.arange(out_size, dtype=jnp.float32)
    src = jnp.maximum((dst + 0.5) * scale - 0.5, 0.0)
    i0 = jnp.minimum(jnp.floor(src).astype(jnp.int32), in_size - 1)
    i1 = jnp.minimum(i0 + 1, in_size - 1)
    frac = src - i0.astype(jnp.float32)
    rows = jnp.arange(out_size)
    w = jnp.zeros((out_size, in_size), dtype=jnp.float32)
    w = w.at[rows, i0].add(1.0 - frac)
    w = w.at[rows, i1].add(frac)
    return w


def _compute_output_size(h: int, w: int, size, max_size):
    """torchvision F.resize output-size rules (int -> smaller edge, tuple -> exact)."""
    if isinstance(size, (tuple, list)):
        if len(size) == 1:
            size = size[0]
        else:
            return int(size[0]), int(size[1])
    short, long = (w, h) if w <= h else (h, w)
    new_short, new_long = size, int(round(size * long / short))
    if max_size is not None and new_long > max_size:
        new_short = int(round(max_size * new_short / new_long))
        new_long = max_size
    out_w, out_h = (new_short, new_long) if w <= h else (new_long, new_short)
    return out_h, out_w


def _pick_tile(nc: int, per_plane_bytes: int, budget_bytes: int) -> int:
    """Largest divisor of nc whose VMEM footprint stays under budget."""
    cap = max(1, budget_bytes // max(per_plane_bytes, 1))
    cap = int(min(cap, nc, 1024))
    for t in range(cap, 0, -1):
        if nc % t == 0:
            return t
    return 1


# ---------------------------------------------------------------------------
# Kernels.
# ---------------------------------------------------------------------------
def _finalize_dtype(vals, dtype):
    if jnp.issubdtype(dtype, jnp.integer):
        # TODO(synk): rounding mode may differ by 1 LSB from torchvision's uint8 path.
        info = jnp.iinfo(dtype)
        vals = jnp.clip(jnp.round(vals), info.min, info.max)
    return vals.astype(dtype)


def _resize_kron_kernel(x_ref, k_ref, o_ref):
    """Fused path: x (TILE, Hi*Wi) @ kron(Wh, Ww).T (Hi*Wi, Ho*Wo) -> (TILE, Ho*Wo)."""
    x = x_ref[...].astype(jnp.float32)
    out = jnp.dot(x, k_ref[...], preferred_element_type=jnp.float32,
                  precision=_PRECISION)
    o_ref[...] = _finalize_dtype(out, o_ref.dtype)


def _make_separable_kernel(h_first: bool):
    """Separable two-pass path: batched matmuls over TILE planes per grid step."""
    def kernel(x_ref, wh_ref, wwt_ref, o_ref):
        tile = x_ref.shape[0]
        x = x_ref[...].astype(jnp.float32)                     # (tile, Hi, Wi)
        wh_b = jnp.broadcast_to(wh_ref[...], (tile,) + tuple(wh_ref.shape))    # (tile, Ho, Hi)
        wwt_b = jnp.broadcast_to(wwt_ref[...], (tile,) + tuple(wwt_ref.shape))  # (tile, Wi, Wo)
        dn = (((2,), (1,)), ((0,), (0,)))                      # contract last-lhs w/ mid-rhs, batch 0
        if h_first:
            t = jax.lax.dot_general(wh_b, x, dn,
                                    preferred_element_type=jnp.float32,
                                    precision=_PRECISION)       # (tile, Ho, Wi)
            out = jax.lax.dot_general(t, wwt_b, dn,
                                      preferred_element_type=jnp.float32,
                                      precision=_PRECISION)     # (tile, Ho, Wo)
        else:
            t = jax.lax.dot_general(x, wwt_b, dn,
                                    preferred_element_type=jnp.float32,
                                    precision=_PRECISION)       # (tile, Hi, Wo)
            out = jax.lax.dot_general(wh_b, t, dn,
                                      preferred_element_type=jnp.float32,
                                      precision=_PRECISION)     # (tile, Ho, Wo)
        o_ref[...] = _finalize_dtype(out, o_ref.dtype)
    return kernel


# ---------------------------------------------------------------------------
# Wrapper.
# ---------------------------------------------------------------------------
def resize_bilinear(img: jnp.ndarray, out_h: int, out_w: int) -> jnp.ndarray:
    """Bilinear resize of an (..., H, W) image stack, PyTorch semantics (no antialias)."""
    *lead, hi, wi = (int(s) for s in img.shape)
    lead = tuple(lead)
    nc = int(math.prod(lead)) if lead else 1
    in_dt = img.dtype
    itemsize = jnp.dtype(in_dt).itemsize

    wh = _bilinear_weight_matrix(hi, out_h)       # (Ho, Hi) f32
    ww = _bilinear_weight_matrix(wi, out_w)       # (Wo, Wi) f32

    compiler_params = pltpu.CompilerParams(
        dimension_semantics=("parallel",),        # plane axis -> megacore shardable
        vmem_limit_bytes=_VMEM_LIMIT)

    kron_bytes = hi * wi * out_h * out_w * 4
    if kron_bytes <= _KRON_BYTES_LIMIT:
        # ---- Fused single-matmul path (small planes): lane-dense loads & stores.
        kmat = jnp.kron(wh, ww).T                 # (Hi*Wi, Ho*Wo), exact (<=4 nonzeros/col)
        x2 = jnp.reshape(img, (nc, hi * wi))      # free row-major reshape in the wrapper
        per_plane = hi * wi * (2 * itemsize + 4) + out_h * out_w * (2 * itemsize + 4)
        tile = _pick_tile(nc, per_plane, _VMEM_BUDGET - 2 * kron_bytes)
        out = pl.pallas_call(
            _resize_kron_kernel,
            out_shape=jax.ShapeDtypeStruct((nc, out_h * out_w), in_dt),
            grid_spec=pltpu.PrefetchScalarGridSpec(
                num_scalar_prefetch=0,
                grid=(nc // tile,),
                in_specs=[
                    pl.BlockSpec((tile, hi * wi), lambda i: (i, 0)),
                    pl.BlockSpec((hi * wi, out_h * out_w), lambda i: (0, 0)),
                ],
                out_specs=pl.BlockSpec((tile, out_h * out_w), lambda i: (i, 0)),
            ),
            compiler_params=compiler_params,
        )(x2, kmat)
        return jnp.reshape(out, lead + (out_h, out_w))

    # ---- Separable two-pass path (larger planes).
    h_first_flops = out_h * wi * (hi + out_w)
    w_first_flops = hi * out_w * (wi + out_h)
    h_first = h_first_flops <= w_first_flops
    inter = (out_h * wi) if h_first else (hi * out_w)
    fixed = 2 * 4 * (out_h * hi + wi * out_w)                  # double-buffered weights
    per_plane = (hi * wi * (2 * itemsize + 4)                  # input block (2x) + f32 copy
                 + out_h * out_w * (2 * itemsize + 4)          # output block (2x) + f32 result
                 + 4 * inter                                   # intermediate
                 + 4 * (out_h * hi + wi * out_w))              # broadcast weight temporaries
    tile = _pick_tile(nc, per_plane, _VMEM_BUDGET - fixed)

    x3 = jnp.reshape(img, (nc, hi, wi))
    out = pl.pallas_call(
        _make_separable_kernel(h_first),
        out_shape=jax.ShapeDtypeStruct((nc, out_h, out_w), in_dt),
        grid_spec=pltpu.PrefetchScalarGridSpec(
            num_scalar_prefetch=0,
            grid=(nc // tile,),
            in_specs=[
                pl.BlockSpec((tile, hi, wi), lambda i: (i, 0, 0)),
                pl.BlockSpec((out_h, hi), lambda i: (0, 0)),
                pl.BlockSpec((wi, out_w), lambda i: (0, 0)),
            ],
            out_specs=pl.BlockSpec((tile, out_h, out_w), lambda i: (i, 0, 0)),
        ),
        compiler_params=compiler_params,
    )(x3, wh, ww.T)
    return jnp.reshape(out, lead + (out_h, out_w))


# ---------------------------------------------------------------------------
# ResizePair equivalent.
# ---------------------------------------------------------------------------
class ResizePair:
    def __init__(self, size, interpolation="bilinear", max_size=None, antialias=None):
        # TODO(synk): only bilinear is implemented; antialias=True path not implemented.
        self.size = size
        self.interpolation = interpolation
        self.max_size = max_size
        self.antialias = antialias

    def _resize_one(self, img):
        h, w = int(img.shape[-2]), int(img.shape[-1])
        out_h, out_w = _compute_output_size(h, w, self.size, self.max_size)
        if (out_h, out_w) == (h, w):
            return img
        return resize_bilinear(img, out_h, out_w)

    def __call__(self, img_pair):
        return tuple(self._resize_one(img) for img in img_pair)


# ---------------------------------------------------------------------------
# Pure-JAX reference (same bilinear weights) for a sanity check.
# ---------------------------------------------------------------------------
def _reference_resize(img, out_h, out_w):
    hi, wi = int(img.shape[-2]), int(img.shape[-1])
    wh = _bilinear_weight_matrix(hi, out_h)
    ww = _bilinear_weight_matrix(wi, out_w)
    out = jnp.einsum("oh,pw,...hw->...op", wh, ww, img.astype(jnp.float32),
                     precision=_PRECISION)
    return out.astype(img.dtype)


if __name__ == "__main__":
    key = jax.random.PRNGKey(0)
    k0, k1, k2, k3 = jax.random.split(key, 4)

    # Pair of NCHW images, batch=2, channels=4, spatial=16x16 -> smaller edge 8 (fused path).
    img_a = jax.random.uniform(k0, (2, 4, 16, 16), dtype=jnp.float32)
    img_b = jax.random.uniform(k1, (2, 4, 16, 16), dtype=jnp.float32)
    op = ResizePair(size=8)
    out_a, out_b = op((img_a, img_b))
    jax.block_until_ready(out_a)
    jax.block_until_ready(out_b)
    assert out_a.shape == (2, 4, 8, 8), out_a.shape
    assert out_b.shape == (2, 4, 8, 8), out_b.shape
    assert out_a.dtype == jnp.float32 and out_b.dtype == jnp.float32
    assert float(jnp.max(jnp.abs(out_a - _reference_resize(img_a, 8, 8)))) < 2e-2
    assert float(jnp.max(jnp.abs(out_b - _reference_resize(img_b, 8, 8)))) < 2e-2

    # Larger planes -> separable two-pass path (both H-first and W-first variants).
    img_c = jax.random.uniform(k2, (1, 2, 48, 64), dtype=jnp.float32)
    img_d = jax.random.uniform(k3, (1, 2, 32, 256), dtype=jnp.float32)
    op2 = ResizePair(size=(24, 32))
    out_c, out_d = op2((img_c, img_d))
    jax.block_until_ready(out_c)
    jax.block_until_ready(out_d)
    assert out_c.shape == (1, 2, 24, 32), out_c.shape
    assert out_d.shape == (1, 2, 24, 32), out_d.shape
    assert float(jnp.max(jnp.abs(out_c - _reference_resize(img_c, 24, 32)))) < 2e-2
    assert float(jnp.max(jnp.abs(out_d - _reference_resize(img_d, 24, 32)))) < 2e-2

    print("KERNEL_OK")
</pallas_src>

<mosaic_0001>
module attributes {stable_mosaic.version = 11 : i64} {
  func.func @_resize_kron_kernel(%arg0: i32, %arg1: memref<8x256xf32, #tpu.memory_space<vmem>>, %arg2: memref<256x64xf32, #tpu.memory_space<vmem>>, %arg3: memref<8x64xf32, #tpu.memory_space<vmem>>) attributes {dimension_semantics = [#tpu.dimension_semantics<parallel>], iteration_bounds = array<i64: 1>, scalar_prefetch = 0 : i64, scratch_operands = 0 : i64, tpu.core_type = #tpu.core_type<tc>, window_params = [{transform_indices = @transform_0, window_bounds = array<i64: 8, 256>}, {pipeline_mode = #tpu.pipeline_mode<synchronous>, transform_indices = @transform_1, window_bounds = array<i64: 256, 64>}, {transform_indices = @transform_2, window_bounds = array<i64: 8, 64>}]} {
    %c0 = arith.constant 0 : index
    %c0_0 = arith.constant 0 : index
    %0 = vector.load %arg1[%c0, %c0_0] : memref<8x256xf32, #tpu.memory_space<vmem>>, vector<8x256xf32>
    %c0_1 = arith.constant 0 : index
    %c0_2 = arith.constant 0 : index
    %1 = vector.load %arg2[%c0_1, %c0_2] : memref<256x64xf32, #tpu.memory_space<vmem>>, vector<256x64xf32>
    %cst = arith.constant dense<0.000000e+00> : vector<8x64xf32>
    %2 = tpu.matmul %0, %1, %cst {dimension_numbers = #tpu.dot_dimension_numbers<[1], [0], [0], [1], [0, 0, 1, 1], [], []>, precision = #tpu.contract_precision<fp32>} : vector<8x256xf32>, vector<256x64xf32>, vector<8x64xf32> -> vector<8x64xf32>
    %c0_3 = arith.constant 0 : index
    %c0_4 = arith.constant 0 : index
    %3 = vector.load %arg3[%c0_3, %c0_4] : memref<8x64xf32, #tpu.memory_space<vmem>>, vector<8x64xf32>
    tpu.vector_store %arg3[%c0_3, %c0_4], %2 {strides = array<i32>} : memref<8x64xf32, #tpu.memory_space<vmem>>, vector<8x64xf32>,
    return
  }
  func.func @transform_0(%arg0: i32) -> (i32, i32) {
    %c0_i32 = arith.constant 0 : i32
    %c0_i32_0 = arith.constant 0 : i32
    return %arg0, %c0_i32 : i32, i32
  }
  func.func @transform_1(%arg0: i32) -> (i32, i32) {
    %c0_i32 = arith.constant 0 : i32
    %c0_i32_0 = arith.constant 0 : i32
    %c0_i32_1 = arith.constant 0 : i32
    return %c0_i32, %c0_i32_0 : i32, i32
  }
  func.func @transform_2(%arg0: i32) -> (i32, i32) {
    %c0_i32 = arith.constant 0 : i32
    %c0_i32_0 = arith.constant 0 : i32
    return %arg0, %c0_i32 : i32, i32
  }
}

</mosaic_0001>

<bundles_post_ra>
// kernel: tpu_custom_call.1
= control target key start
LH: loop header
LB: loop body
LE: loop exit
PB: predicated region body
PF: predicated region fallthrough
CT: control target
= control target key end

     0   :  { %s1884_s0 = inlined_call_operand.vmem [shape: f32[8,256], index: 0, kind: input, shape index: {}]   ;;  %s1885_s1 = inlined_call_operand.vmem [shape: f32[256,64], index: 1, kind: input, shape index: {}]   ;;  %s1886_s2 = inlined_call_operand.hbm [shape: f32[8,64], index: 2, kind: output, shape index: {}]  }
   0x1   :  { %v45_v0 = vld [vmem:[%s1885_s1 + $0xf8] sm:$0xff]  ;;  %v44_v2 = vld [vmem:[%s1885_s1 + $0xf0] sm:$0xff]  ;;  %v43_v7 = vld [vmem:[%s1885_s1 + $0xe8] sm:$0xff] }
   0x2   :  { %v29_v1 = vld [vmem:[%s1885_s1 + $0x78] sm:$0xff]  ;;  %v1182_v3 = vand.u32 4294901760, %v45_v0  ;;  %v1186_v5 = vand.u32 4294901760, %v44_v2  ;;  %v28_v6 = vld [vmem:[%s1885_s1 + $0x70] sm:$0xff]  ;;  %v27_v8 = vld [vmem:[%s1885_s1 + $0x68] sm:$0xff]  ;;  %v1199_v10 = vand.u32 4294901760, %v43_v7 }
   0x3   :  { %v1184_v4 = vand.u32 4294901760, %v29_v1  ;;  %v1197_v9 = vand.u32 4294901760, %v28_v6  ;;  %v1201_v11 = vand.u32 4294901760, %v27_v8  ;;  %v42_v12 = vld [vmem:[%s1885_s1 + $0xe0] sm:$0xff]  ;;  %v1212_v14 = vld [vmem:[%s1885_s1 + $0xd8] sm:$0xff]  ;;  %v1233_v20 = vld [vmem:[%s1885_s1 + $0xd0] sm:$0xff] }
   0x4   :  { %v26_v13 = vld [vmem:[%s1885_s1 + $0x60] sm:$0xff]  ;;  %924 = vmatprep.subr.mxu0 %v1182_v3  ;;  %v1215_v15 = vand.u32 4294901760, %v42_v12  ;;  %v1220_v17 = vand.u32 4294901760, %v1212_v14  ;;  %v1223_v18 = vsub.f32 %v45_v0, %v1182_v3  ;;  %v1228_v19 = vld [vmem:[%s1885_s1 + $0x58] sm:$0xff]  ;;  %v1238_v21 = vld [vmem:[%s1885_s1 + $0x50] sm:$0xff]  ;;  %v1248_v24 = vand.u32 4294901760, %v1233_v20 }
   0x5   :  { %v1217_v16 = vand.u32 4294901760, %v26_v13  ;;  %925 = vmatpush3.msra.mxu0 %v1184_v4  ;;  %v1242_v22 = vand.u32 4294901760, %v1228_v19  ;;  %v1245_v23 = vsub.f32 %v29_v1, %v1184_v4  ;;  %v1251_v25 = vsub.f32 %v44_v2, %v1186_v5  ;;  %v1256_v26 = vld [vmem:[%s1885_s1 + $0xc8] sm:$0xff]  ;;  %v1266_v28 = vld [vmem:[%s1885_s1 + $0xc0] sm:$0xff]  ;;  %v1318_v46 = vld [vmem:[%s1885_s1 + $0xb8] sm:$0xff] }
   0x6   :  { %v1261_v27 = vld [vmem:[%s1885_s1 + $0x48] sm:$0xff]  ;;  %926 = vmatprep.subr.mxu0 %v1186_v5  ;;  %v1900_v29 = vand.u32 4294901760, %v1223_v18  ;;  %v1271_v30 = vand.u32 4294901760, %v1238_v21  ;;  %v1274_v31 = vsub.f32 %v28_v6, %v1197_v9  ;;  %v1277_v32 = vand.u32 4294901760, %v1256_v26  ;;  %v1291_v37 = vld [vmem:[%s1885_s1 + $0x40] sm:$0xff]  ;;  %v1331_v51 = vld [vmem:[%s1885_s1 + $0x38] sm:$0xff] }
   0x7   :  { %927 = vmatpush3.msra.mxu0 %v1197_v9  ;;  %v1899_v33 = vand.u32 4294901760, %v1245_v23  ;;  %v1897_v34 = vand.u32 4294901760, %v1251_v25  ;;  %v1283_v35 = vsub.f32 %v43_v7, %v1199_v10  ;;  %v1286_v36 = vand.u32 4294901760, %v1261_v27  ;;  %v1341_v56 = vld [vmem:[%s1885_s1 + $0xb0] sm:$0xff] }
   0x8   :  { %1956 = vst [vmem:[#allocation5_spill] sm:$0xff] %v1271_v30  ;;  %1957 = vst [vmem:[#allocation6_spill] sm:$0xff] %v1277_v32  ;;  %928 = vmatprep.subr.mxu0 %v1199_v10  ;;  %v274_v38 = vsub.f32 %v1223_v18, %v1900_v29  ;;  %v1896_v39 = vand.u32 4294901760, %v1274_v31  ;;  %v1299_v40 = vsub.f32 %v27_v8, %v1201_v11  ;;  %v1302_v41 = vand.u32 4294901760, %v1266_v28  ;;  %v1356_v61 = vld [vmem:[%s1885_s1 + $0x30] sm:$0xff] }
   0x9   :  { %1958 = vst [vmem:[#allocation7_spill] sm:$0xff] %v1286_v36  ;;  %929 = vmatpush3.msra.mxu0 %v1201_v11  ;;  %v162_v42 = vsub.f32 %v1245_v23, %v1899_v33  ;;  %v281_v43 = vsub.f32 %v1251_v25, %v1897_v34  ;;  %v1894_v44 = vand.u32 4294901760, %v1283_v35  ;;  %v1313_v45 = vsub.f32 %v42_v12, %v1215_v15 }
   0xa   :  { %1959 = vst [vmem:[#allocation8_spill] sm:$0xff] %v1302_v41  ;;  %930 = vmatprep.subr.mxu0 %v1215_v15  ;;  %v275_v47 = vand.u32 4294901760, %v274_v38  ;;  %v169_v48 = vsub.f32 %v1274_v31, %v1896_v39  ;;  %v1892_v49 = vand.u32 4294901760, %v1299_v40  ;;  %v1326_v50 = vand.u32 4294901760, %v1291_v37 }
   0xb   :  { %931 = vmatpush3.msra.mxu0 %v1217_v16  ;;  %v163_v52 = vand.u32 4294901760, %v162_v42  ;;  %v282_v53 = vand.u32 4294901760, %v281_v43  ;;  %v288_v54 = vsub.f32 %v1283_v35, %v1894_v44  ;;  %v1891_v55 = vand.u32 4294901760, %v1313_v45 }
   0xc   :  { %1960 = vst [vmem:[#allocation9_spill] sm:$0xff] %v1326_v50  ;;  %932 = vmatprep.subr.mxu0 %v1220_v17  ;;  %959 = vmatprep.subr.mxu1 %v275_v47  ;;  %v170_v57 = vand.u32 4294901760, %v169_v48  ;;  %v176_v58 = vsub.f32 %v1299_v40, %v1892_v49  ;;  %v1348_v59 = vsub.f32 %v26_v13, %v1217_v16  ;;  %v1351_v60 = vand.u32 4294901760, %v1318_v46 }
   0xe   :  { %1961 = vst [vmem:[#allocation10_spill] sm:$0xff] %v1351_v60 }
   0xf   :  { %7 = vsyncpa [#allocation3], 0  ;;  %933 = vmatpush3.msra.mxu0 %v1242_v22  ;;  %960 = vmatpush3.msra.mxu1 %v163_v52  ;;  %v289_v62 = vand.u32 4294901760, %v288_v54  ;;  %v295_v63 = vsub.f32 %v1313_v45, %v1891_v55  ;;  %v1364_v0 = vsub.f32 %v1212_v14, %v1220_v17  ;;  %v1367_v1 = vand.u32 4294901760, %v1331_v51  ;;  %v1372_v2 = vld [vmem:[%s1885_s1 + $0xa8] sm:$0xff]  ;;  %v1465_v49 = vld [vmem:[%s1885_s1 + $0x18] sm:$0xff] }
  0x10   :  { %934 = vmatprep.subr.mxu0 %v1248_v24  ;;  %961 = vmatprep.subr.mxu1 %v282_v53  ;;  %v177_v6 = vand.u32 4294901760, %v176_v58  ;;  %v1889_v7 = vand.u32 4294901760, %v1348_v59  ;;  %v1378_v8 = vsub.f32 %v1228_v19, %v1242_v22  ;;  %v1381_v12 = vand.u32 4294901760, %v1341_v56  ;;  %v1386_v13 = vld [vmem:[%s1885_s1 + $0x28] sm:$0xff]  ;;  %v1481_v44 = vld [vmem:[%s1885_s1 + $0x90] sm:$0xff] }
  0x11   :  { %1962 = vst [vmem:[#allocation11_spill] sm:$0xff] %v1367_v1  ;;  %935 = vmatpush3.msra.mxu0 %v1271_v30  ;;  %962 = vmatpush3.msra.mxu1 %v170_v57  ;;  %v296_v14 = vand.u32 4294901760, %v295_v63  ;;  %v1887_v38 = vand.u32 4294901760, %v1364_v0  ;;  %v1392_v42 = vsub.f32 %v1233_v20, %v1248_v24  ;;  %v1395_v19 = vand.u32 4294901760, %v1356_v61  ;;  %v1412_v20 = vld [vmem:[%s1885_s1 + $0xa0] sm:$0xff]  ;;  %v1508_v33 = vld [vmem:[%s1885_s1 + $0x88] sm:$0xff] }
  0x12   :  { %1963 = vst [vmem:[#allocation12_spill] sm:$0xff] %v1381_v12  ;;  %936 = vmatprep.subr.mxu0 %v1277_v32  ;;  %963 = vmatprep.subr.mxu1 %v289_v62  ;;  %v183_v43 = vsub.f32 %v1348_v59, %v1889_v7  ;;  %v1888_v47 = vand.u32 4294901760, %v1378_v8  ;;  %v1404_v48 = vsub.f32 %v1238_v21, %v1271_v30  ;;  %v1407_v52 = vand.u32 4294901760, %v1372_v2 }
  0x13   :  { %1964 = vst [vmem:[#allocation13_spill] sm:$0xff] %v1395_v19  ;;  %937 = vmatpush3.msra.mxu0 %v1286_v36  ;;  %964 = vmatpush3.msra.mxu1 %v177_v6  ;;  %v302_v53 = vsub.f32 %v1364_v0, %v1887_v38  ;;  %v1890_v54 = vand.u32 4294901760, %v1392_v42  ;;  %v1421_v21 = vsub.f32 %v1256_v26, %v1277_v32  ;;  %v1424_v57 = vand.u32 4294901760, %v1386_v13  ;;  %v1438_v26 = vld [vmem:[%s1885_s1 + $0x20] sm:$0xff] }
  0x14   :  { %1965 = vst [vmem:[#allocation14_spill] sm:$0xff] %v1407_v52  ;;  %938 = vmatprep.subr.mxu0 %v1302_v41  ;;  %965 = vmatprep.subr.mxu1 %v296_v14  ;;  %v184_v58 = vand.u32 4294901760, %v183_v43  ;;  %v190_v62 = vsub.f32 %v1378_v8, %v1888_v47  ;;  %v1893_v63 = vand.u32 4294901760, %v1404_v48  ;;  %v1433_v6 = vsub.f32 %v1261_v27, %v1286_v36  ;;  %v1451_v27 = vld [vmem:[%s1885_s1 + $0x98] sm:$0xff] }
  0x15   :  { %1966 = vst [vmem:[#allocation15_spill] sm:$0xff] %v1424_v57  ;;  %939 = vmatpush3.msra.mxu0 %v1326_v50  ;;  %v303_v38 = vand.u32 4294901760, %v302_v53  ;;  %v309_v14 = vsub.f32 %v1392_v42, %v1890_v54  ;;  %v1895_v43 = vand.u32 4294901760, %v1421_v21  ;;  %v1446_v47 = vand.u32 4294901760, %v1412_v20 }
  0x16   :  { %966 = vmatpush3.msra.mxu1 %v184_v58  ;;  %940 = vmatprep.subr.mxu0 %v1351_v60  ;;  %v191_v7 = vand.u32 4294901760, %v190_v62  ;;  %v197_v53 = vsub.f32 %v1404_v48, %v1893_v63  ;;  %v1898_v54 = vand.u32 4294901760, %v1433_v6  ;;  %v1460_v55 = vsub.f32 %v1266_v28, %v1302_v41  ;;  %v12_v41 = vld [vmem:[%s1884_s0] sm:$0xff] }
  0x17   :  { %1967 = vst [vmem:[#allocation16_spill] sm:$0xff] %v1446_v47  ;;  %967 = vmatprep.subr.mxu1 %v303_v38  ;;  %941 = vmatpush3.msra.mxu0 %v1367_v1  ;;  %v310_v58 = vand.u32 4294901760, %v309_v14  ;;  %v316_v62 = vsub.f32 %v1421_v21, %v1895_v43  ;;  %v1472_v63 = vand.u32 4294901760, %v1438_v26  ;;  %v1476_v28 = vsub.f32 %v1291_v37, %v1326_v50  ;;  %v1494_v37 = vld [vmem:[%s1885_s1 + $0x10] sm:$0xff] }
  0x18   :  { %968 = vmatpush3.msra.mxu1 %v191_v7  ;;  %942 = vmatprep.subr.mxu0 %v1381_v12  ;;  %v198_v38 = vand.u32 4294901760, %v197_v53  ;;  %v204_v14 = vsub.f32 %v1433_v6, %v1898_v54  ;;  %v1903_v43 = vand.u32 4294901760, %v1460_v55  ;;  %v1489_v39 = vand.u32 4294901760, %v1451_v27 }
  0x19   :  { %1968 = vst [vmem:[#allocation17_spill] sm:$0xff] %v1472_v63  ;;  %969 = vmatprep.subr.mxu1 %v310_v58  ;;  %943 = vmatpush3.msra.mxu0 %v1395_v19  ;;  %v317_v7 = vand.u32 4294901760, %v316_v62  ;;  %v1904_v53 = vand.u32 4294901760, %v1476_v28  ;;  %v1500_v34 = vsub.f32 %v1318_v46, %v1351_v60  ;;  %v1503_v54 = vand.u32 4294901760, %v1465_v49 }
  0x1a   :  { %970 = vmatpush3.msra.mxu1 %v198_v38  ;;  %944 = vmatprep.subr.mxu0 %v1407_v52  ;;  %v205_v58 = vand.u32 4294901760, %v204_v14  ;;  %v323_v62 = vsub.f32 %v1460_v55, %v1903_v43  ;;  %v1516_v46 = vsub.f32 %v1331_v51, %v1367_v1  ;;  %v1519_v29 = vand.u32 4294901760, %v1481_v44  ;;  %v1536_v51 = vld [vmem:[%s1885_s1 + $0x8] sm:$0xff] }
  0x1b   :  { %1969 = vst [vmem:[#allocation18_spill] sm:$0xff] %v1503_v54  ;;  %971 = vmatprep.subr.mxu1 %v317_v7  ;;  %945 = vmatpush3.msra.mxu0 %v1424_v57  ;;  %v211_v38 = vsub.f32 %v1476_v28, %v1904_v53  ;;  %v1528_v60 = vsub.f32 %v1341_v56, %v1381_v12  ;;  %v1531_v43 = vand.u32 4294901760, %v1494_v37  ;;  %v1545_v56 = vand.u32 4294901760, %v1508_v33  ;;  %v1550_v12 = vld [vmem:[%s1885_s1 + $0x80] sm:$0xff] }
  0x1c   :  { %1970 = vst [vmem:[#allocation19_spill] sm:$0xff] %v1519_v29  ;;  %972 = vmatpush3.msra.mxu1 %v205_v58  ;;  %946 = vmatprep.subr.mxu0 %v1446_v47  ;;  %v324_v7 = vand.u32 4294901760, %v323_v62  ;;  %v1542_v14 = vsub.f32 %v1356_v61, %v1395_v19  ;;  %v1974_v1 = vand.u32 4294901760, %v1500_v34  ;;  %v1559_v61 = vsub.f32 %v1372_v2, %v1407_v52  ;;  %v1576_v2 = vld [vmem:[%s1885_s1] sm:$0xff] }
  0x1d   :  { %1971 = vst [vmem:[#allocation20_spill] sm:$0xff] %v1531_v43  ;;  %1973 = vst [vmem:[#allocation22_spill] sm:$0xff] %v1545_v56  ;;  %947 = vmatpush3.msra.mxu0 %v1472_v63  ;;  %v212_v58 = vand.u32 4294901760, %v211_v38  ;;  %v1921_v53 = vand.u32 4294901760, %v1528_v60  ;;  %v1976_v19 = vand.u32 4294901760, %v1516_v46  ;;  %v1567_v38 = vand.u32 4294901760, %v1536_v51 }
  0x1e   :  { %1972 = vst [vmem:[#allocation21_spill] sm:$0xff] %v1542_v14  ;;  %v330_v62 = vsub.f32 %v1500_v34, %v1974_v1  ;;  %1975 = vst [vmem:[#allocation23_spill] sm:$0xff] %v1559_v61  ;;  %973 = vmatprep.subr.mxu1 %v324_v7  ;;  %948 = vmatprep.subr.mxu0 %v1489_v39  ;;  %v1571_v1 = vsub.f32 %v1386_v13, %v1424_v57  ;;  %v1584_v52 = vand.u32 4294901760, %v1550_v12  ;;  %v13_v13 = vld [vmem:[%s1884_s0 + $0x8] sm:$0xff]  ;;  %s1157_s0 = smov [#allocation2]   ;;  %vm908_vm0 = vcmask 523264  }
  0x1f   :  { %v218_v50 = vsub.f32 %v1516_v46, %v1976_v19  ;;  %974 = vmatpush3.msra.mxu1 %v212_v58  ;;  %949 = vmatpush3.msra.mxu0 %v1503_v54  ;;  %v337_v19 = vsub.f32 %v1528_v60, %v1921_v53  ;;  %v1977_v58 = vand.u32 4294901760, %v1542_v14  ;;  %v1596_v53 = vsub.f32 %v1412_v20, %v1446_v47  ;;  %s916_s20 = sshll.u32 %s1157_s0, 4  ;;  %s917_s20 = int_to_ptr.vmem [resolvable:$true] %s916_s20 }
  0x20   :  { %v331_v7 = vand.u32 4294901760, %v330_v62  ;;  %950 = vmatprep.subr.mxu0 %v1519_v29  ;;  %v1610_v36 = vsub.f32 %v1438_v26, %v1472_v63  ;;  %v1625_v26 = vand.u32 4294901760, %v12_v41  ;;  %s1135_s21 = scalar_lea.vmem %s917_s20, 128  ;;  %p1140_p1 = scmp.lt.s32.totalorder %s917_s20, %s917_s20 }
  0x21   :  { %v219_v57 = vand.u32 4294901760, %v218_v50  ;;  %v225_v62 = vsub.f32 %v1542_v14, %v1977_v58  ;;  %v338_v32 = vand.u32 4294901760, %v337_v19  ;;  %951 = vmatpush3.msra.mxu0 %v1531_v43  ;;  %v1978_v50 = vand.u32 4294901760, %v1559_v61  ;;  %p1136_p0 = scmp.ne.s32.totalorder %s917_s20, %s1135_s21  ;;  %p1141_p2 = scmp.lt.s32.totalorder %s1135_s21, %s1135_s21 }
  0x22   :  { %975 = vmatprep.subr.mxu1 %v331_v7  ;;  %v1606_v58 = vand.u32 4294901760, %v1576_v2  ;;  %952 = vmatprep.subr.mxu0 %v1545_v56  ;;  %v1979_v7 = vand.u32 4294901760, %v1571_v1  ;;  %v1932_v47 = vand.u32 4294901760, %v1596_v53  ;;  %v1617_v14 = vand.u32 4294901760, %v13_v13  ;;  %1981 = vst [vmem:[#allocation25_spill] sm:$0xff] %v1625_v26 }
  0x23   :  { %v344_v30 = vsub.f32 %v1559_v61, %v1978_v50  ;;  %976 = vmatpush3.msra.mxu1 %v219_v57  ;;  %v226_v20 = vand.u32 4294901760, %v225_v62  ;;  %953 = vmatpush3.msra.mxu0 %v1567_v38  ;;  %v1933_v61 = vand.u32 4294901760, %v1610_v36  ;;  %v1623_v57 = vsub.f32 %v1451_v27, %v1489_v39  ;;  %p1142_p3 = por %p1141_p2, %p1140_p1 }
  0x24   :  { %v232_v19 = vsub.f32 %v1571_v1, %v1979_v7  ;;  %1980 = vst [vmem:[#allocation24_spill] sm:$0xff] %v1617_v14  ;;  %977 = vmatprep.subr.mxu1 %v338_v32  ;;  %954 = vmatprep.subr.mxu0 %v1584_v52  ;;  %v351_v7 = vsub.f32 %v1596_v53, %v1932_v47 }
  0x25   :  { %v345_v50 = vand.u32 4294901760, %v344_v30  ;;  %978 = vmatpush3.msra.mxu1 %v226_v20  ;;  %v1632_v30 = vsub.f32 %v13_v13, %v1617_v14  ;;  %v1636_v32 = vsub.f32 %v1465_v49, %v1503_v54  ;;  %955 = vmatpush3.msra.mxu0 %v1606_v58  ;;  %v239_v27 = vsub.f32 %v1610_v36, %v1933_v61  ;;  %p1143_p4 = pnand %p1142_p3, %p1136_p0 }
  0x26   :  { %v233_v62 = vand.u32 4294901760, %v232_v19  ;;  %v1644_v19 = vsub.f32 %v12_v41, %v1625_v26  ;;  %v1648_v13 = vsub.f32 %v1481_v44, %v1519_v29  ;;  %v352_v47 = vand.u32 4294901760, %v351_v7  ;;  %994 = vmatprep.subr.mxu0 %v1223_v18  ;;  %383 = vmatprep.mubr.f32.mxu1 %v1617_v14 }
  0x27   :  { %979 = vmatprep.subr.mxu1 %v345_v50  ;;  %v1938_v49 = vand.u32 4294901760, %v1632_v30  ;;  %v1941_v50 = vand.u32 4294901760, %v1636_v32  ;;  %v1655_v61 = vsub.f32 %v1494_v37, %v1531_v43  ;;  %v240_v20 = vand.u32 4294901760, %v239_v27 }
  0x28   :  { %980 = vmatpush3.msra.mxu1 %v233_v62  ;;  %v1982_v41 = vand.u32 4294901760, %v1623_v57  ;;  %v1983_v62 = vand.u32 4294901760, %v1644_v19  ;;  %v1984_v14 = vand.u32 4294901760, %v1648_v13  ;;  %v1682_v43 = vsub.f32 %v1536_v51, %v1567_v38 }
  0x29   :  { %981 = vmatprep.subr.mxu1 %v352_v47  ;;  %v145_v7 = vsub.f32 %v1632_v30, %v1938_v49  ;;  %v246_v37 = vsub.f32 %v1636_v32, %v1941_v50  ;;  %v1986_v29 = vand.u32 4294901760, %v1655_v61 }
  0x2a   :  { %v358_v54 = vsub.f32 %v1623_v57, %v1982_v41  ;;  %v1672_v41 = vsub.f32 %v1508_v33, %v1545_v56  ;;  %982 = vmatpush3.msra.mxu1 %v240_v20  ;;  %v151_v47 = vsub.f32 %v1644_v19, %v1983_v62  ;;  %v365_v49 = vsub.f32 %v1648_v13, %v1984_v14 }
  0x2b   :  { %1985 = vst [vmem:[#allocation26_spill] sm:$0xff] %v1682_v43  ;;  %v146_v50 = vand.u32 4294901760, %v145_v7  ;;  %v247_v27 = vand.u32 4294901760, %v246_v37  ;;  %v253_v33 = vsub.f32 %v1655_v61, %v1986_v29  ;;  %v1948_v62 = vand.u32 4294901760, %v1682_v43 }
  0x2c   :  { %v359_v44 = vand.u32 4294901760, %v358_v54  ;;  %v1949_v54 = vand.u32 4294901760, %v1672_v41  ;;  %v152_v20 = vand.u32 4294901760, %v151_v47  ;;  %v366_v56 = vand.u32 4294901760, %v365_v49 }
  0x2d   :  { %v1691_v14 = vsub.f32 %v1550_v12, %v1584_v52  ;;  %147 = vmatprep.mubr.f32.mxu0 %v146_v50  ;;  %v254_v51 = vand.u32 4294901760, %v253_v33  ;;  %v1698_v29 = vsub.f32 %v1576_v2, %v1606_v58  ;;  %v260_v49 = vsub.f32 %v1682_v43, %v1948_v62  ;;  %v1989_v33 = vld [vmem:[#allocation21_spill] sm:$0xff]  ;;  %v2002_v62 = vld [vmem:[#allocation16_spill] sm:$0xff] }
  0x2e   :  { %983 = vmatprep.subr.mxu1 %v359_v44  ;;  %v372_v7 = vsub.f32 %v1672_v41, %v1949_v54  ;;  %153 = vmatmul.mubr.f32.vlgmr.msra.gmra.mxu0 %v152_v20  ;;  %v1990_v20 = vld [vmem:[#allocation5_spill] sm:$0xff]  ;;  %v2003_v54 = vand.u32 4294901760, %v1223_v18  ;;  %v2011_v18 = vand.u32 4294901760, %v1283_v35 }
  0x2f   :  { %1987 = vst [vmem:[#allocation27_spill] sm:$0xff] %v1691_v14  ;;  %984 = vmatpush3.msra.mxu1 %v247_v27  ;;  %1988 = vst [vmem:[#allocation28_spill] sm:$0xff] %v1698_v29  ;;  %v1947_v12 = vand.u32 4294901760, %v1691_v14  ;;  %995 = vmatpush3.msra.mxu0 %v1245_v23  ;;  %v1946_v44 = vand.u32 4294901760, %v1698_v29  ;;  %v261_v37 = vand.u32 4294901760, %v260_v49  ;;  %v1993_v49 = vld [vmem:[#allocation7_spill] sm:$0xff] }
  0x30   :  { %985 = vmatprep.subr.mxu1 %v366_v56  ;;  %v373_v50 = vand.u32 4294901760, %v372_v7  ;;  %996 = vmatprep.subr.mxu0 %v1251_v25  ;;  %v1992_v7 = vld [vmem:[#allocation6_spill] sm:$0xff] }
  0x31   :  { %986 = vmatpush3.msra.mxu1 %v254_v51  ;;  %v379_v2 = vsub.f32 %v1691_v14, %v1947_v12  ;;  %520 = vmatprep.mubr.f32.mxu0 %v1632_v30  ;;  %v267_v56 = vsub.f32 %v1698_v29, %v1946_v44  ;;  %v1991_v51 = vld [vmem:[#allocation23_spill] sm:$0xff]  ;;  %v2000_v44 = vld [vmem:[#allocation14_spill] sm:$0xff] }
  0x32   :  { %997 = vmatpush3.msra.mxu0 %v1274_v31  ;;  %987 = vmatprep.subr.mxu1 %v373_v50  ;;  %v1994_v50 = vld [vmem:[#allocation8_spill] sm:$0xff]  ;;  %v2001_v12 = vld [vmem:[#allocation15_spill] sm:$0xff] }
  0x33   :  { %998 = vmatprep.subr.mxu0 %v1283_v35  ;;  %988 = vmatpush3.msra.mxu1 %v261_v37  ;;  %v380_v27 = vand.u32 4294901760, %v379_v2  ;;  %v268_v47 = vand.u32 4294901760, %v267_v56  ;;  %v1995_v37 = vld [vmem:[#allocation9_spill] sm:$0xff]  ;;  %v1996_v2 = vld [vmem:[#allocation10_spill] sm:$0xff]  ;;  %v1997_v56 = vld [vmem:[#allocation11_spill] sm:$0xff]  ;;  %v2016_v35 = vand.u32 4294901760, %v1644_v19 }
  0x34   :  { %999 = vmatpush3.msra.mxu0 %v1299_v40 }
  0x35   :  { %989 = vmatprep.subr.mxu1 %v380_v27  ;;  %1000 = vmatprep.subr.mxu0 %v1313_v45  ;;  %v1998_v27 = vld [vmem:[#allocation12_spill] sm:$0xff] }
  0x36   :  { %990 = vmatpush3.msra.mxu1 %v268_v47  ;;  %1001 = vmatpush3.msra.mxu0 %v1348_v59  ;;  %v1999_v47 = vld [vmem:[#allocation13_spill] sm:$0xff] }
  0x37   :  { %385 = vmatmul.mubr.f32.vlgmr.msra.gmra.mxu1 %v1625_v26  ;;  %1002 = vmatprep.subr.mxu0 %v1364_v0  ;;  %v2004_v26 = vld [vmem:[#allocation18_spill] sm:$0xff] }
  0x38   :  { %1029 = vmatprep.subr.mxu1 %v1182_v3  ;;  %1003 = vmatpush3.msra.mxu0 %v1378_v8 }
  0x39   :  { %1030 = vmatpush3.msra.mxu1 %v1184_v4  ;;  %1004 = vmatprep.subr.mxu0 %v1392_v42 }
  0x3a   :  { %1031 = vmatprep.subr.mxu1 %v1186_v5  ;;  %1005 = vmatpush3.msra.mxu0 %v1404_v48 }
  0x3b   :  { %1032 = vmatpush3.msra.mxu1 %v1197_v9  ;;  %1006 = vmatprep.subr.mxu0 %v1421_v21 }
  0x3c   :  { %1033 = vmatprep.subr.mxu1 %v1199_v10  ;;  %1007 = vmatpush3.msra.mxu0 %v1433_v6 }
  0x3d   :  { %1034 = vmatpush3.msra.mxu1 %v1201_v11  ;;  %1008 = vmatprep.subr.mxu0 %v1460_v55 }
  0x3e   :  { %1035 = vmatprep.subr.mxu1 %v1215_v15  ;;  %1009 = vmatpush3.msra.mxu0 %v1476_v28 }
  0x3f   :  { %1036 = vmatpush3.msra.mxu1 %v1217_v16  ;;  %1010 = vmatprep.subr.mxu0 %v1500_v34 }
  0x40   :  { %1037 = vmatprep.subr.mxu1 %v1220_v17  ;;  %1011 = vmatpush3.msra.mxu0 %v1516_v46 }
  0x41   :  { %1038 = vmatpush3.msra.mxu1 %v1242_v22  ;;  %1012 = vmatprep.subr.mxu0 %v1528_v60 }
  0x42   :  { %1039 = vmatprep.subr.mxu1 %v1248_v24  ;;  %1013 = vmatpush3.msra.mxu0 %v1989_v33 }
  0x43   :  { %1040 = vmatpush3.msra.mxu1 %v1990_v20  ;;  %1014 = vmatprep.subr.mxu0 %v1991_v51 }
  0x44   :  { %1041 = vmatprep.subr.mxu1 %v1992_v7  ;;  %1015 = vmatpush3.msra.mxu0 %v1571_v1 }
  0x45   :  { %1042 = vmatpush3.msra.mxu1 %v1993_v49  ;;  %1016 = vmatprep.subr.mxu0 %v1596_v53 }
  0x46   :  { %1043 = vmatprep.subr.mxu1 %v1994_v50  ;;  %1017 = vmatpush3.msra.mxu0 %v1610_v36 }
  0x47   :  { %1044 = vmatpush3.msra.mxu1 %v1995_v37  ;;  %1018 = vmatprep.subr.mxu0 %v1623_v57 }
  0x48   :  { %1045 = vmatprep.subr.mxu1 %v1996_v2  ;;  %1019 = vmatpush3.msra.mxu0 %v1636_v32 }
  0x49   :  { %1046 = vmatpush3.msra.mxu1 %v1997_v56  ;;  %1020 = vmatprep.subr.mxu0 %v1648_v13 }
  0x4a   :  { %1047 = vmatprep.subr.mxu1 %v1998_v27  ;;  %1021 = vmatpush3.msra.mxu0 %v1655_v61 }
  0x4b   :  { %1048 = vmatpush3.msra.mxu1 %v1999_v47  ;;  %1022 = vmatprep.subr.mxu0 %v1672_v41 }
  0x4c   :  { %1049 = vmatprep.subr.mxu1 %v2000_v44  ;;  %1023 = vmatpush3.msra.mxu0 %v1682_v43  ;;  %v2005_v43 = vand.u32 4294901760, %v1245_v23  ;;  %v2012_v23 = vand.u32 4294901760, %v1299_v40  ;;  %v2018_v40 = vand.u32 4294901760, %v1378_v8  ;;  %v2037_v8 = vand.u32 4294901760, %v1672_v41 }
  0x4d   :  { %1050 = vmatpush3.msra.mxu1 %v2001_v12  ;;  %1024 = vmatprep.subr.mxu0 %v1691_v14  ;;  %v2006_v12 = vld [vmem:[#allocation19_spill] sm:$0xff]  ;;  %v2010_v14 = vld [vmem:[#allocation22_spill] sm:$0xff] }
  0x4e   :  { %1051 = vmatprep.subr.mxu1 %v2002_v62  ;;  %1025 = vmatpush3.msra.mxu0 %v1698_v29  ;;  %v2007_v62 = vand.u32 4294901760, %v1251_v25  ;;  %v2008_v29 = vld [vmem:[#allocation20_spill] sm:$0xff]  ;;  %v2013_v25 = vand.u32 4294901760, %v1313_v45  ;;  %v2019_v45 = vand.u32 4294901760, %v1392_v42  ;;  %v2038_v42 = vld [vmem:[#allocation26_spill] sm:$0xff] }
  0x4f   :  { %1052 = vmatpush3.msra.mxu1 %v1472_v63  ;;  %523 = vmatmul.mubr.f32.vlgmr.msra.gmra.mxu0 %v1644_v19  ;;  %v2009_v63 = vand.u32 4294901760, %v1274_v31  ;;  %v2014_v31 = vand.u32 4294901760, %v1632_v30  ;;  %v2048_v30 = vld [vmem:[#allocation25_spill] sm:$0xff] }
  0x50   :  { %1053 = vmatprep.subr.mxu1 %v1489_v39  ;;  %1064 = vmatprep.subr.mxu0 %v2003_v54 }
  0x51   :  { %1054 = vmatpush3.msra.mxu1 %v2004_v26  ;;  %1065 = vmatpush3.msra.mxu0 %v2005_v43  ;;  %v2017_v43 = vand.u32 4294901760, %v1364_v0  ;;  %v2021_v0 = vand.u32 4294901760, %v1421_v21  ;;  %v2040_v21 = vld [vmem:[#allocation15_spill] sm:$0xff] }
  0x52   :  { %1055 = vmatprep.subr.mxu1 %v2006_v12  ;;  %1066 = vmatprep.subr.mxu0 %v2007_v62 }
  0x53   :  { %1056 = vmatpush3.msra.mxu1 %v2008_v29  ;;  %1067 = vmatpush3.msra.mxu0 %v2009_v63  ;;  %v2015_v63 = vand.u32 4294901760, %v1348_v59  ;;  %v2020_v59 = vand.u32 4294901760, %v1404_v48  ;;  %v2039_v48 = vand.u32 4294901760, %v2038_v42 }
  0x54   :  { %1057 = vmatprep.subr.mxu1 %v2010_v14  ;;  %1068 = vmatprep.subr.mxu0 %v2011_v18 }
  0x55   :  { %1058 = vmatpush3.msra.mxu1 %v1567_v38  ;;  %1069 = vmatpush3.msra.mxu0 %v2012_v23 }
  0x56   :  { %1059 = vmatprep.subr.mxu1 %v1584_v52  ;;  %1070 = vmatprep.subr.mxu0 %v2013_v25 }
  0x57   :  { %1060 = vmatpush3.msra.mxu1 %v1606_v58  ;;  %627 = vmatprep.mubr.f32.mxu1 %v2014_v31 }
  0x58   :  { %1071 = vmatpush3.msra.mxu0 %v2015_v63  ;;  %631 = vmatmul.mubr.f32.vlgmr.msra.gmra.mxu1 %v2016_v35 }
  0x59   :  { %1072 = vmatprep.subr.mxu0 %v2017_v43  ;;  %1099 = vmatprep.subr.mxu1 %v1182_v3  ;;  %v2022_v3 = vand.u32 4294901760, %v1433_v6  ;;  %v2041_v6 = vld [vmem:[#allocation27_spill] sm:$0xff] }
  0x5a   :  { %1073 = vmatpush3.msra.mxu0 %v2018_v40  ;;  %1100 = vmatpush3.msra.mxu1 %v1184_v4  ;;  %v2023_v4 = vand.u32 4294901760, %v1460_v55  ;;  %v2034_v55 = vand.u32 4294901760, %v1636_v32 }
  0x5b   :  { %1074 = vmatprep.subr.mxu0 %v2019_v45  ;;  %1101 = vmatprep.subr.mxu1 %v1186_v5  ;;  %v2024_v5 = vand.u32 4294901760, %v1476_v28  ;;  %v2042_v28 = vand.u32 4294901760, %v2041_v6 }
  0x5c   :  { %1075 = vmatpush3.msra.mxu0 %v2020_v59  ;;  %1102 = vmatpush3.msra.mxu1 %v1197_v9  ;;  %v2025_v9 = vand.u32 4294901760, %v1500_v34  ;;  %v2033_v34 = vand.u32 4294901760, %v1623_v57  ;;  %v2047_v57 = vld [vmem:[#allocation17_spill] sm:$0xff] }
  0x5d   :  { %1076 = vmatprep.subr.mxu0 %v2021_v0  ;;  %1103 = vmatprep.subr.mxu1 %v1199_v10  ;;  %v2026_v10 = vand.u32 4294901760, %v1516_v46  ;;  %v2044_v46 = vld [vmem:[#allocation28_spill] sm:$0xff] }
  0x5e   :  { %1077 = vmatpush3.msra.mxu0 %v2022_v3  ;;  %1104 = vmatpush3.msra.mxu1 %v1201_v11  ;;  %v2027_v11 = vand.u32 4294901760, %v1528_v60  ;;  %v2035_v60 = vand.u32 4294901760, %v1648_v13 }
  0x5f   :  { %1078 = vmatprep.subr.mxu0 %v2023_v4  ;;  %1105 = vmatprep.subr.mxu1 %v1215_v15  ;;  %v2028_v15 = vand.u32 4294901760, %v1989_v33 }
  0x60   :  { %1079 = vmatpush3.msra.mxu0 %v2024_v5  ;;  %1106 = vmatpush3.msra.mxu1 %v1217_v16  ;;  %v2029_v16 = vand.u32 4294901760, %v1991_v51 }
  0x61   :  { %1080 = vmatprep.subr.mxu0 %v2025_v9  ;;  %1107 = vmatprep.subr.mxu1 %v1220_v17  ;;  %v2030_v17 = vand.u32 4294901760, %v1571_v1  ;;  %v2046_v1 = vld [vmem:[#allocation24_spill] sm:$0xff] }
  0x62   :  { %1081 = vmatpush3.msra.mxu0 %v2026_v10  ;;  %1108 = vmatpush3.msra.mxu1 %v1242_v22  ;;  %v2031_v22 = vand.u32 4294901760, %v1596_v53  ;;  %v2043_v53 = vld [vmem:[#allocation16_spill] sm:$0xff] }
  0x63   :  { %1082 = vmatprep.subr.mxu0 %v2027_v11  ;;  %1109 = vmatprep.subr.mxu1 %v1248_v24  ;;  %v2032_v24 = vand.u32 4294901760, %v1610_v36  ;;  %v2036_v36 = vand.u32 4294901760, %v1655_v61  ;;  %v2045_v61 = vand.u32 4294901760, %v2044_v46 }
  0x64   :  { %1083 = vmatpush3.msra.mxu0 %v2028_v15  ;;  %1110 = vmatpush3.msra.mxu1 %v1990_v20 }
  0x65   :  { %1084 = vmatprep.subr.mxu0 %v2029_v16  ;;  %1111 = vmatprep.subr.mxu1 %v1992_v7 }
  0x66   :  { %1085 = vmatpush3.msra.mxu0 %v2030_v17  ;;  %1112 = vmatpush3.msra.mxu1 %v1993_v49 }
  0x67   :  { %1086 = vmatprep.subr.mxu0 %v2031_v22  ;;  %1113 = vmatprep.subr.mxu1 %v1994_v50 }
  0x68   :  { %1087 = vmatpush3.msra.mxu0 %v2032_v24  ;;  %1114 = vmatpush3.msra.mxu1 %v1995_v37 }
  0x69   :  { %1088 = vmatprep.subr.mxu0 %v2033_v34  ;;  %1115 = vmatprep.subr.mxu1 %v1996_v2 }
  0x6a   :  { %1089 = vmatpush3.msra.mxu0 %v2034_v55  ;;  %1116 = vmatpush3.msra.mxu1 %v1997_v56 }
  0x6b   :  { %1090 = vmatprep.subr.mxu0 %v2035_v60  ;;  %1117 = vmatprep.subr.mxu1 %v1998_v27 }
  0x6c   :  { %1091 = vmatpush3.msra.mxu0 %v2036_v36  ;;  %1118 = vmatpush3.msra.mxu1 %v1999_v47 }
  0x6d   :  { %1092 = vmatprep.subr.mxu0 %v2037_v8  ;;  %1119 = vmatprep.subr.mxu1 %v2000_v44 }
  0x6e   :  { %1093 = vmatpush3.msra.mxu0 %v2039_v48  ;;  %1120 = vmatpush3.msra.mxu1 %v2040_v21 }
  0x6f   :  { %1094 = vmatprep.subr.mxu0 %v2042_v28  ;;  %1121 = vmatprep.subr.mxu1 %v2043_v53 }
  0x70   :  { %1095 = vmatpush3.msra.mxu0 %v2045_v61  ;;  %797 = vmatprep.mubr.f32.mxu0 %v2046_v1 }
  0x71   :  { %1122 = vmatpush3.msra.mxu1 %v2047_v57  ;;  %799 = vmatmul.mubr.f32.vlgmr.msra.gmra.mxu0 %v2048_v30 }
  0x72   :  { %1123 = vmatprep.subr.mxu1 %v1489_v39  ;;  %901 = vmatprep.mubr.f32.mxu1 %v2046_v1 }
  0x73   :  { %1124 = vmatpush3.msra.mxu1 %v2004_v26 }
  0x74   :  { %1125 = vmatprep.subr.mxu1 %v2006_v12 }
  0x75   :  { %1126 = vmatpush3.msra.mxu1 %v2008_v29 }
  0x76   :  { %1127 = vmatprep.subr.mxu1 %v2010_v14 }
  0x77   :  { %1128 = vmatpush3.msra.mxu1 %v1567_v38 }
  0x78   :  { %1129 = vmatprep.subr.mxu1 %v1584_v52 }
  0x79   :  { %1130 = vmatpush3.msra.mxu1 %v1606_v58 }
  0x7a   :  { %903 = vmatmul.mubr.f32.vlgmr.msra.gmra.mxu1 %v2048_v30 }
  0xee   :  { %v956_v32 = vpop.f32.mrf.mxu0 }
  0xf0   :  { %v957_v39 = vpop.f32.mrf.mxu0 }
  0xf1   :  { %v958_v44 = vadd.f32 %v957_v39, %v956_v32 }
  0xf7   :  { %v991_v19 = vpop.f32.mrf.mxu1 }
  0xf9   :  { %v992_v41 = vpop.f32.mrf.mxu1 }
  0xfa   :  { %v993_v12 = vadd.f32 %v992_v41, %v991_v19 }
  0xfc   :  { %v387_v38 = vadd.f32 %v993_v12, %v958_v44 }
 0x10f   :  { %v1026_v13 = vpop.f32.mrf.mxu0 }
 0x111   :  { %v1027_v26 = vpop.f32.mrf.mxu0 }
 0x112   :  { %v1028_v14 = vadd.f32 %v1027_v26, %v1026_v13 }
 0x114   :  { %v525_v52 = vadd.f32 %v1028_v14, %v387_v38 }
 0x118   :  { %v1061_v54 = vpop.f32.mrf.mxu1 }
 0x11a   :  { %v1062_v29 = vpop.f32.mrf.mxu1 }
 0x11b   :  { %v1063_v20 = vadd.f32 %v1062_v29, %v1061_v54 }
 0x11d   :  { %v633_v7 = vadd.f32 %v1063_v20, %v525_v52 }
 0x131   :  { %v1096_v62 = vpop.f32.mrf.mxu0 }
 0x133   :  { %v1097_v33 = vpop.f32.mrf.mxu0 }
 0x134   :  { %v1098_v51 = vadd.f32 %v1097_v33, %v1096_v62 }
 0x136   :  { %v801_v50 = vadd.f32 %v1098_v51, %v633_v7 }
 0x13a   :  { %v1131_v58 = vpop.f32.mrf.mxu1 }
 0x13c   :  { %v1132_v49 = vpop.f32.mrf.mxu1 }
 0x13d   :  { %v1133_v37 = vadd.f32 %v1132_v49, %v1131_v58 }
 0x13f   :  { %v905_v2 = vadd.f32 %v1133_v37, %v801_v50 }
 0x141   :  { %909 = vst.msk [vmem:[#allocation2] sm:$0xff] %vm908_vm0, %v905_v2 }
 0x142   :  { %1146 = shalt.err (!%p1143_p4)
}
 0x143   :  { %919 = dma.vmem_to_hbm [thread:$0]  %s917_s20, 128, %s1886_s2, [#allocation3]  }
 0x144   :  { %1155 = dma.done.wait [#allocation3], 128  }
 0x145   :  { %1156 = vsyncadd [#allocation3], 4294967168 }
 0x146   :  { %923 = vsyncpa [#allocation3], 1 }

</bundles_post_ra>
